<compile_context>
chip_gen: v6e
topology: v6e:2x2x1
jax: 0.10.0
libtpu: 0.0.40
codegen_flags: <defaults>
</compile_context>

<pallas_src>
import functools

import jax
import jax.numpy as jnp
from jax.experimental import pallas as pl
from jax.experimental.pallas import tpu as pltpu

IN_DIM = 6
HID_DIM = 32
OUT_DIM = 4
LANE = 128
CHUNK = 512          # lanes per in-kernel step; (32, CHUNK) f32 hidden = 16 vregs
MIN_GRID_STEPS = 4   # keep the "parallel" batch axis shardable across v7x's 2 TCs


def _round_up(x, m):
    return ((x + m - 1) // m) * m


def _choose_tile(n, block_n):
    """Batch-tile width (lanes): multiple of CHUNK, <= padded batch, >= MIN_GRID_STEPS steps."""
    block_n = max(CHUNK, _round_up(block_n, CHUNK))
    cap = _round_up(max(n, 1), CHUNK)                        # never wider than padded batch
    par = _round_up(max(1, -(-n // MIN_GRID_STEPS)), CHUNK)  # keep >= MIN_GRID_STEPS steps
    return max(CHUNK, min(block_n, cap, par))


def bridge_mlp_kernel(x_ref, w1_ref, b1_ref, w2_ref, b2_ref, o_ref):
    # x_ref : (6, TM)   batch-on-lanes input tile (lane-dense)
    # w1_ref: (32, 6)   b1_ref: (32, 1)
    # w2_ref: (4, 32)   b2_ref: (4, 1)
    # o_ref : (4, TM)   lane-dense output tile
    w1 = w1_ref[...]
    b1 = b1_ref[...].astype(jnp.float32)
    w2 = w2_ref[...].astype(jnp.float32)   # f32 second GEMM: no hidden-act quantization
    b2 = b2_ref[...].astype(jnp.float32)

    tm = x_ref.shape[1]
    # Static chunk loop: static slices are zero-cost ref views; the (32, CHUNK)
    # hidden activation never round-trips VMEM through the single vst slot.
    for c in range(tm // CHUNK):
        lo, hi = c * CHUNK, (c + 1) * CHUNK
        x = x_ref[:, lo:hi]
        # Layer 1 on the MXU: (32, 6) @ (6, CHUNK) -> (32, CHUNK), f32 acc.
        h = jnp.dot(w1, x, preferred_element_type=jnp.float32)
        # Bias + ReLU on the VPU in f32 (v5e has no bf16 VALU).
        h = jnp.maximum(h + b1, 0.0)
        # Layer 2 on the MXU in f32: (4, 32) @ (32, CHUNK) -> (4, CHUNK).
        y = jnp.dot(w2, h, preferred_element_type=jnp.float32)
        o_ref[:, lo:hi] = (y + b2).astype(o_ref.dtype)


@functools.partial(jax.jit, static_argnames=("block_n", "out_dtype"))
def bridge_nn_forward_fm(x_fm, w1, b1, w2, b2, *, block_n=32768,
                         out_dtype=jnp.float32):
    """Feature-major fast path (no layout copies).

    x_fm: (6, N) (f32 or bf16), batch on the trailing axis.
    w1: (32, 6), b1: (32,)   -- PyTorch nn.Linear layout (out, in)
    w2: (4, 32), b2: (4,)
    returns (4, N) in `out_dtype`.
    """
    n = x_fm.shape[1]
    assert x_fm.shape == (IN_DIM, n)
    assert w1.shape == (HID_DIM, IN_DIM) and b1.shape == (HID_DIM,)
    assert w2.shape == (OUT_DIM, HID_DIM) and b2.shape == (OUT_DIM,)

    tm = _choose_tile(n, block_n)
    grid = (pl.cdiv(n, tm),)

    b1c = b1.reshape(HID_DIM, 1)
    b2c = b2.reshape(OUT_DIM, 1)

    io_bytes = (x_fm.size * x_fm.dtype.itemsize
                + n * OUT_DIM * jnp.dtype(out_dtype).itemsize
                + w1.size * w1.dtype.itemsize + b1.size * b1.dtype.itemsize
                + w2.size * w2.dtype.itemsize + b2.size * b2.dtype.itemsize)
    cost = pl.CostEstimate(
        flops=2 * n * (IN_DIM * HID_DIM + HID_DIM * OUT_DIM),
        transcendentals=0,
        bytes_accessed=io_bytes,
    )

    return pl.pallas_call(
        bridge_mlp_kernel,
        out_shape=jax.ShapeDtypeStruct((OUT_DIM, n), out_dtype),
        grid=grid,
        in_specs=[
            pl.BlockSpec((IN_DIM, tm), lambda i: (0, i)),        # x tile (lane-dense)
            pl.BlockSpec((HID_DIM, IN_DIM), lambda i: (0, 0)),   # W1, VMEM-resident
            pl.BlockSpec((HID_DIM, 1), lambda i: (0, 0)),        # b1
            pl.BlockSpec((OUT_DIM, HID_DIM), lambda i: (0, 0)),  # W2
            pl.BlockSpec((OUT_DIM, 1), lambda i: (0, 0)),        # b2
        ],
        out_specs=pl.BlockSpec((OUT_DIM, tm), lambda i: (0, i)),
        compiler_params=pltpu.CompilerParams(
            dimension_semantics=("parallel",),
            vmem_limit_bytes=32 * 1024 * 1024),
        cost_estimate=cost,
    )(x_fm, w1, b1c, w2, b2c)


@functools.partial(jax.jit, static_argnames=("block_n", "out_dtype"))
def bridge_nn_forward(x, w1, b1, w2, b2, *, block_n=32768,
                      out_dtype=jnp.float32):
    """Drop-in BridgeNN forward: x (N, 6) -> (N, 4).

    NOTE: the two boundary transposes each add a full HBM read+write pass on
    top of the bandwidth-bound kernel; prefer `bridge_nn_forward_fm` whenever
    the producer/consumer can keep the data feature-major.
    """
    n = x.shape[0]
    assert x.shape == (n, IN_DIM)
    out_fm = bridge_nn_forward_fm(x.T, w1, b1, w2, b2,
                                  block_n=block_n, out_dtype=out_dtype)
    return out_fm.T


def init_params(key, dtype=jnp.float32):
    """PyTorch nn.Linear-shaped params: W (out, in), b (out,), U(-1/sqrt(fan_in), +)."""
    k1, k2, k3, k4 = jax.random.split(key, 4)
    bound1 = 1.0 / jnp.sqrt(jnp.float32(IN_DIM))
    bound2 = 1.0 / jnp.sqrt(jnp.float32(HID_DIM))
    w1 = jax.random.uniform(k1, (HID_DIM, IN_DIM), jnp.float32, -bound1, bound1)
    b1 = jax.random.uniform(k2, (HID_DIM,), jnp.float32, -bound1, bound1)
    w2 = jax.random.uniform(k3, (OUT_DIM, HID_DIM), jnp.float32, -bound2, bound2)
    b2 = jax.random.uniform(k4, (OUT_DIM,), jnp.float32, -bound2, bound2)
    return (w1.astype(dtype), b1.astype(dtype), w2.astype(dtype), b2.astype(dtype))


def _reference(x, w1, b1, w2, b2):
    # Same math as the PyTorch module (nn.Linear: y = x @ W.T + b).
    return jnp.maximum(x @ w1.T + b1, 0.0) @ w2.T + b2


if __name__ == "__main__":
    key = jax.random.PRNGKey(0)
    kx, kp = jax.random.split(key)

    w1, b1, w2, b2 = init_params(kp)

    # Row-major (module-compatible) path, f32: lane-aligned batch (256) plus a
    # ragged batch (200) to exercise the masked partial-tile writeback.
    for batch in (256, 200):
        x = jax.random.normal(jax.random.fold_in(kx, batch), (batch, IN_DIM),
                              jnp.float32)
        out = jax.block_until_ready(bridge_nn_forward(x, w1, b1, w2, b2))
        ref = _reference(x, w1, b1, w2, b2)
        assert out.shape == (batch, OUT_DIM)
        assert jnp.allclose(out, ref, atol=1e-5, rtol=1e-5), (
            "f32 row-major mismatch", float(jnp.max(jnp.abs(out - ref))))

    # Feature-major fast path (no boundary transposes), f32.
    xf = jax.random.normal(jax.random.fold_in(kx, 7), (IN_DIM, 384), jnp.float32)
    out_fm = jax.block_until_ready(bridge_nn_forward_fm(xf, w1, b1, w2, b2))
    ref_fm = _reference(xf.T, w1, b1, w2, b2).T
    assert out_fm.shape == (OUT_DIM, 384)
    assert jnp.allclose(out_fm, ref_fm, atol=1e-5, rtol=1e-5), (
        "f32 feature-major mismatch", float(jnp.max(jnp.abs(out_fm - ref_fm))))

    # bf16-at-the-HBM-boundary path with bf16 output (f32 math inside the kernel).
    xb = jax.random.normal(kx, (256, IN_DIM), jnp.float32)
    out_bf16 = jax.block_until_ready(
        bridge_nn_forward(xb.astype(jnp.bfloat16),
                          w1.astype(jnp.bfloat16), b1.astype(jnp.bfloat16),
                          w2.astype(jnp.bfloat16), b2.astype(jnp.bfloat16),
                          out_dtype=jnp.bfloat16))
    ref = _reference(xb, w1, b1, w2, b2)
    assert out_bf16.shape == (256, OUT_DIM)
    assert out_bf16.dtype == jnp.bfloat16
    assert jnp.allclose(out_bf16.astype(jnp.float32), ref, atol=5e-2, rtol=5e-2), (
        "bf16 mismatch", float(jnp.max(jnp.abs(out_bf16.astype(jnp.float32) - ref))))

    print("KERNEL_OK")
</pallas_src>

<mosaic_0001>
module attributes {stable_mosaic.version = 11 : i64} {
  func.func @bridge_mlp_kernel(%arg0: i32, %arg1: memref<6x512xf32, #tpu.memory_space<vmem>>, %arg2: memref<32x6xf32, #tpu.memory_space<vmem>>, %arg3: memref<32x1xf32, #tpu.memory_space<vmem>>, %arg4: memref<4x32xf32, #tpu.memory_space<vmem>>, %arg5: memref<4x1xf32, #tpu.memory_space<vmem>>, %arg6: memref<4x512xf32, #tpu.memory_space<vmem>>) attributes {dimension_semantics = [#tpu.dimension_semantics<parallel>], iteration_bounds = array<i64: 1>, scalar_prefetch = 0 : i64, scratch_operands = 0 : i64, tpu.core_type = #tpu.core_type<tc>, window_params = [{transform_indices = @transform_0, window_bounds = array<i64: 6, 512>}, {pipeline_mode = #tpu.pipeline_mode<synchronous>, transform_indices = @transform_1, window_bounds = array<i64: 32, 6>}, {pipeline_mode = #tpu.pipeline_mode<synchronous>, transform_indices = @transform_2, window_bounds = array<i64: 32, 1>}, {pipeline_mode = #tpu.pipeline_mode<synchronous>, transform_indices = @transform_3, window_bounds = array<i64: 4, 32>}, {pipeline_mode = #tpu.pipeline_mode<synchronous>, transform_indices = @transform_4, window_bounds = array<i64: 4, 1>}, {transform_indices = @transform_5, window_bounds = array<i64: 4, 512>}]} {
    %c0 = arith.constant 0 : index
    %c0_0 = arith.constant 0 : index
    %0 = vector.load %arg2[%c0, %c0_0] : memref<32x6xf32, #tpu.memory_space<vmem>>, vector<32x6xf32>
    %c0_1 = arith.constant 0 : index
    %c0_2 = arith.constant 0 : index
    %1 = vector.load %arg3[%c0_1, %c0_2] : memref<32x1xf32, #tpu.memory_space<vmem>>, vector<32x1xf32>
    %c0_3 = arith.constant 0 : index
    %c0_4 = arith.constant 0 : index
    %2 = vector.load %arg4[%c0_3, %c0_4] : memref<4x32xf32, #tpu.memory_space<vmem>>, vector<4x32xf32>
    %c0_5 = arith.constant 0 : index
    %c0_6 = arith.constant 0 : index
    %3 = vector.load %arg5[%c0_5, %c0_6] : memref<4x1xf32, #tpu.memory_space<vmem>>, vector<4x1xf32>
    %c0_7 = arith.constant 0 : index
    %c0_8 = arith.constant 0 : index
    %4 = vector.load %arg1[%c0_7, %c0_8] : memref<6x512xf32, #tpu.memory_space<vmem>>, vector<6x512xf32>
    %cst = arith.constant dense<0.000000e+00> : vector<32x512xf32>
    %5 = tpu.matmul %0, %4, %cst {dimension_numbers = #tpu.dot_dimension_numbers<[1], [0], [0], [1], [0, 0, 1, 1], [], []>} : vector<32x6xf32>, vector<6x512xf32>, vector<32x512xf32> -> vector<32x512xf32>
    %6 = vector.broadcast %1 : vector<32x1xf32> to vector<32x512xf32>
    %7 = arith.addf %5, %6 : vector<32x512xf32>
    %cst_9 = arith.constant 0.000000e+00 : f32
    %8 = vector.broadcast %cst_9 : f32 to vector<32x512xf32>
    %9 = arith.maximumf %7, %8 : vector<32x512xf32>
    %cst_10 = arith.constant dense<0.000000e+00> : vector<4x512xf32>
    %10 = tpu.matmul %2, %9, %cst_10 {dimension_numbers = #tpu.dot_dimension_numbers<[1], [0], [0], [1], [0, 0, 1, 1], [], []>} : vector<4x32xf32>, vector<32x512xf32>, vector<4x512xf32> -> vector<4x512xf32>
    %11 = vector.broadcast %3 : vector<4x1xf32> to vector<4x512xf32>
    %12 = arith.addf %10, %11 : vector<4x512xf32>
    %c0_11 = arith.constant 0 : index
    %c0_12 = arith.constant 0 : index
    %13 = vector.load %arg6[%c0_11, %c0_12] : memref<4x512xf32, #tpu.memory_space<vmem>>, vector<4x512xf32>
    tpu.vector_store %arg6[%c0_11, %c0_12], %12 {strides = array<i32>} : memref<4x512xf32, #tpu.memory_space<vmem>>, vector<4x512xf32>,
    return
  }
  func.func @transform_0(%arg0: i32) -> (i32, i32) {
    %c0_i32 = arith.constant 0 : i32
    %c0_i32_0 = arith.constant 0 : i32
    return %c0_i32, %arg0 : i32, i32
  }
  func.func @transform_1(%arg0: i32) -> (i32, i32) {
    %c0_i32 = arith.constant 0 : i32
    %c0_i32_0 = arith.constant 0 : i32
    %c0_i32_1 = arith.constant 0 : i32
    return %c0_i32, %c0_i32_0 : i32, i32
  }
  func.func @transform_2(%arg0: i32) -> (i32, i32) {
    %c0_i32 = arith.constant 0 : i32
    %c0_i32_0 = arith.constant 0 : i32
    %c0_i32_1 = arith.constant 0 : i32
    return %c0_i32, %c0_i32_0 : i32, i32
  }
  func.func @transform_3(%arg0: i32) -> (i32, i32) {
    %c0_i32 = arith.constant 0 : i32
    %c0_i32_0 = arith.constant 0 : i32
    %c0_i32_1 = arith.constant 0 : i32
    return %c0_i32, %c0_i32_0 : i32, i32
  }
  func.func @transform_4(%arg0: i32) -> (i32, i32) {
    %c0_i32 = arith.constant 0 : i32
    %c0_i32_0 = arith.constant 0 : i32
    %c0_i32_1 = arith.constant 0 : i32
    return %c0_i32, %c0_i32_0 : i32, i32
  }
  func.func @transform_5(%arg0: i32) -> (i32, i32) {
    %c0_i32 = arith.constant 0 : i32
    %c0_i32_0 = arith.constant 0 : i32
    return %c0_i32, %arg0 : i32, i32
  }
}

</mosaic_0001>

<bundles_post_ra>
// kernel: bridge_nn_forward_fm.1
= control target key start
LH: loop header
LB: loop body
LE: loop exit
PB: predicated region body
PF: predicated region fallthrough
CT: control target
= control target key end

     0   :  { %10 = vsyncpa [#allocation3], 0  ;;  %vm68_vm0 = vcmask 1045504   ;;  %v491_v3 = vmov 0.0   ;;  %vm55_vm1 = vcmask 48128   ;;  %v492_v9 = vmov 0   ;;  %s577_s0 = inlined_call_operand.vmem [shape: f32[6,256], index: 0, kind: input, shape index: {}]   ;;  %s578_s1 = inlined_call_operand.vmem [shape: f32[32,6], index: 1, kind: input, shape index: {}]   ;;  %s579_s2 = inlined_call_operand.vmem [shape: f32[32,1], index: 2, kind: input, shape index: {}]   ;;  %s580_s3 = inlined_call_operand.vmem [shape: f32[4,32], index: 3, kind: input, shape index: {}]   ;;  %s581_s4 = inlined_call_operand.vmem [shape: f32[4,1], index: 4, kind: input, shape index: {}]   ;;  %s582_s5 = inlined_call_operand.hbm [shape: f32[4,256], index: 5, kind: output, shape index: {}]  }
   0x1   :  { %v32_v0 = vld [vmem:[%s577_s0 + $0x8] sm:$0x3f]  ;;  %v34_v1 = vld [vmem:[%s577_s0 + $0x18] sm:$0x3f]  ;;  %v31_v2 = vld [vmem:[%s577_s0] sm:$0x3f]  ;;  %145 = vmatprep.mubr.f32.mxu0 %v491_v3  ;;  %234 = vmatprep.mubr.f32.mxu1 %v491_v3 }
   0x2   :  { %450 = vmatprep.subr.msk.mxu0 %vm68_vm0, %v32_v0  ;;  %v33_v4 = vld [vmem:[%s577_s0 + $0x10] sm:$0x3f]  ;;  %456 = vmatprep.subr.msk.mxu1 %vm68_vm0, %v34_v1  ;;  %v21_v5 = vld [vmem:[%s578_s1] sm:$0xff]  ;;  %v26_v6 = vld [vmem:[%s579_s2 + $0x8] sm:$0xff]  ;;  %vm280_vm2 = vcmask 261120  }
   0x3   :  { %451 = vmatpush1.msk.msra.mxu0 %vm68_vm0, %v31_v2  ;;  %457 = vmatpush1.msk.msra.mxu1 %vm68_vm0, %v33_v4  ;;  %v28_v7 = vld [vmem:[%s579_s2 + $0x18] sm:$0xff]  ;;  %v22_v8 = vld [vmem:[%s578_s1 + $0x8] sm:$0xff]  ;;  %v25_v10 = vld [vmem:[%s579_s2] sm:$0xff] }
   0x4   :  { %452 = vmatmul.mubr.msk.f32.vlgmr.msra.gmra.mxu0 %vm55_vm1, %v21_v5  ;;  %458 = vmatmul.mubr.msk.f32.vlgmr.msra.gmra.mxu1 %vm55_vm1, %v21_v5  ;;  %v27_v11 = vld [vmem:[%s579_s2 + $0x10] sm:$0xff]  ;;  %v30_v13 = vld [vmem:[%s581_s4] sm:$0xf]  ;;  %v24_v14 = vld [vmem:[%s578_s1 + $0x18] sm:$0xff] }
   0x5   :  { %151 = vmatprep.mubr.f32.mxu0 %v491_v3  ;;  %240 = vmatprep.mubr.f32.mxu1 %v491_v3  ;;  %v23_v12 = vld [vmem:[%s578_s1 + $0x10] sm:$0xff] }
   0x6   :  { %468 = vset.pattern.permute.xlu1 %v492_v9  ;;  %467 = vset.pattern.permute.xlu0 %v492_v9 }
   0x7   :  { %42 = vperm.xlu1 %468, %v26_v6   ;;  %52 = vperm.xlu0 %467, %v28_v7  }
   0x8   :  { %453 = vmatmul.mubr.msk.f32.gmra.mxu0 %vm55_vm1, %v22_v8  ;;  %459 = vmatmul.mubr.msk.f32.gmra.mxu1 %vm55_vm1, %v22_v8 }
   0x9   :  { %157 = vmatprep.mubr.f32.mxu0 %v491_v3  ;;  %246 = vmatprep.mubr.f32.mxu1 %v491_v3 }
   0xb   :  { %37 = vperm.xlu1 %468, %v25_v10   ;;  %47 = vperm.xlu0 %467, %v27_v11  }
   0xc   :  { %454 = vmatmul.mubr.msk.f32.gmra.mxu0 %vm55_vm1, %v23_v12  ;;  %460 = vmatmul.mubr.msk.f32.gmra.mxu1 %vm55_vm1, %v23_v12 }
   0xd   :  { %163 = vmatprep.mubr.f32.mxu0 %v491_v3  ;;  %252 = vmatprep.mubr.f32.mxu1 %v491_v3 }
   0xf   :  { %277 = vperm.xlu0 %467, %v30_v13  }
  0x10   :  { %455 = vmatmul.mubr.msk.f32.gmra.mxu0 %vm55_vm1, %v24_v14  ;;  %461 = vmatmul.mubr.msk.f32.gmra.mxu1 %vm55_vm1, %v24_v14 }
  0x11   :  { %348 = vmatprep.mubr.f32.mxu0 %v491_v3  ;;  %419 = vmatprep.mubr.f32.mxu1 %v491_v3  ;;  %v29_v3 = vld [vmem:[%s580_s3] sm:$0xf] }
  0x82   :  { %v53_v23 = vpop.permute.xlu0 %52  ;;  %v43_v28 = vpop.permute.xlu1 %42 }
  0x86   :  { %v48_v31 = vpop.permute.xlu0 %47  ;;  %v38_v42 = vpop.permute.xlu1 %37 }
  0x8a   :  { %v278_v6 = vpop.permute.xlu0 %277 }
  0xc4   :  { %v147_v15 = vpop.f32.mrf.mxu0  ;;  %v236_v16 = vpop.f32.mrf.mxu1 }
  0xc5   :  { %v148_v55 = vadd.f32 %v147_v15, %v38_v42  ;;  %v237_v56 = vadd.f32 %v236_v16, %v38_v42 }
  0xc6   :  { %v149_v17 = vpop.f32.mrf.mxu0  ;;  %v238_v18 = vpop.f32.mrf.mxu1 }
  0xc7   :  { %v150_v51 = vadd.f32 %v149_v17, %v38_v42  ;;  %v239_v52 = vadd.f32 %v238_v18, %v38_v42  ;;  %v259_v1 = vmax.f32 %v148_v55, 0.0  ;;  %v261_v2 = vmax.f32 %v237_v56, 0.0 }
  0xc8   :  { %v153_v19 = vpop.f32.mrf.mxu0  ;;  %v242_v20 = vpop.f32.mrf.mxu1 }
  0xc9   :  { %v154_v47 = vadd.f32 %v153_v19, %v43_v28  ;;  %v243_v48 = vadd.f32 %v242_v20, %v43_v28  ;;  %v260_v63 = vmax.f32 %v150_v51, 0.0  ;;  %v262_v0 = vmax.f32 %v239_v52, 0.0 }
  0xca   :  { %v155_v21 = vpop.f32.mrf.mxu0  ;;  %v244_v22 = vpop.f32.mrf.mxu1 }
  0xcb   :  { %v156_v43 = vadd.f32 %v155_v21, %v43_v28  ;;  %v245_v44 = vadd.f32 %v244_v22, %v43_v28  ;;  %v263_v61 = vmax.f32 %v154_v47, 0.0  ;;  %v265_v62 = vmax.f32 %v243_v48, 0.0 }
  0xcc   :  { %v159_v24 = vpop.f32.mrf.mxu0  ;;  %v248_v25 = vpop.f32.mrf.mxu1 }
  0xcd   :  { %v160_v40 = vadd.f32 %v159_v24, %v48_v31  ;;  %v249_v41 = vadd.f32 %v248_v25, %v48_v31  ;;  %v264_v59 = vmax.f32 %v156_v43, 0.0  ;;  %v266_v60 = vmax.f32 %v245_v44, 0.0 }
  0xce   :  { %v161_v26 = vpop.f32.mrf.mxu0  ;;  %v250_v27 = vpop.f32.mrf.mxu1 }
  0xcf   :  { %v162_v36 = vadd.f32 %v161_v26, %v48_v31  ;;  %v251_v37 = vadd.f32 %v250_v27, %v48_v31  ;;  %v267_v57 = vmax.f32 %v160_v40, 0.0  ;;  %v269_v58 = vmax.f32 %v249_v41, 0.0 }
  0xd0   :  { %v165_v29 = vpop.f32.mrf.mxu0  ;;  %v254_v30 = vpop.f32.mrf.mxu1 }
  0xd1   :  { %v166_v32 = vadd.f32 %v165_v29, %v53_v23  ;;  %v255_v33 = vadd.f32 %v254_v30, %v53_v23  ;;  %v268_v53 = vmax.f32 %v162_v36, 0.0  ;;  %v270_v54 = vmax.f32 %v251_v37, 0.0 }
  0xd2   :  { %v167_v34 = vpop.f32.mrf.mxu0  ;;  %v256_v35 = vpop.f32.mrf.mxu1 }
  0xd3   :  { %v168_v38 = vadd.f32 %v167_v34, %v53_v23  ;;  %v257_v39 = vadd.f32 %v256_v35, %v53_v23  ;;  %v271_v49 = vmax.f32 %v166_v32, 0.0  ;;  %v273_v50 = vmax.f32 %v255_v33, 0.0 }
  0xd5   :  { %v272_v45 = vmax.f32 %v168_v38, 0.0  ;;  %v274_v46 = vmax.f32 %v257_v39, 0.0 }
  0xd7   :  { %308 = vmatprep.subr.mxu0 %v272_v45  ;;  %379 = vmatprep.subr.mxu1 %v274_v46 }
  0xd8   :  { %309 = vmatpush1.msra.mxu0 %v271_v49  ;;  %380 = vmatpush1.msra.mxu1 %v273_v50 }
  0xd9   :  { %310 = vmatprep.subr.mxu0 %v268_v53  ;;  %381 = vmatprep.subr.mxu1 %v270_v54 }
  0xda   :  { %311 = vmatpush1.msra.mxu0 %v267_v57  ;;  %382 = vmatpush1.msra.mxu1 %v269_v58 }
  0xdb   :  { %312 = vmatprep.subr.mxu0 %v264_v59  ;;  %383 = vmatprep.subr.mxu1 %v266_v60 }
  0xdc   :  { %313 = vmatpush1.msra.mxu0 %v263_v61  ;;  %384 = vmatpush1.msra.mxu1 %v265_v62 }
  0xdd   :  { %314 = vmatprep.subr.mxu0 %v260_v63  ;;  %385 = vmatprep.subr.mxu1 %v262_v0 }
  0xde   :  { %315 = vmatpush1.msra.mxu0 %v259_v1  ;;  %386 = vmatpush1.msra.mxu1 %v261_v2 }
  0xdf   :  { %462 = vmatmul.mubr.msk.f32.vlgmr.msra.gmra.mxu0 %vm280_vm2, %v29_v3  ;;  %463 = vmatmul.mubr.msk.f32.vlgmr.msra.gmra.mxu1 %vm280_vm2, %v29_v3 }
 0x19f   :  { %v350_v4 = vpop.f32.mrf.mxu0  ;;  %v421_v5 = vpop.f32.mrf.mxu1 }
 0x1a0   :  { %v351_v9 = vadd.f32 %v350_v4, %v278_v6  ;;  %v422_v10 = vadd.f32 %v421_v5, %v278_v6 }
 0x1a1   :  { %v352_v7 = vpop.f32.mrf.mxu0  ;;  %v423_v8 = vpop.f32.mrf.mxu1 }
 0x1a2   :  { %v353_v11 = vadd.f32 %v352_v7, %v278_v6  ;;  %v424_v12 = vadd.f32 %v423_v8, %v278_v6 }
 0x1a4   :  { %v430_v13 = vcombine.low %v351_v9, %v353_v11  ;;  %v431_v14 = vcombine.low %v422_v10, %v424_v12 }
 0x1a6   :  { %434 = vst [vmem:[#allocation2] sm:$0xff] %v430_v13  ;;  %435 = vst [vmem:[#allocation2 + $0x8] sm:$0xff] %v431_v14 }
 0x1a7   :  { %440 = vsyncadd [#allocation3], 128  ;;  %s493_s3 = smov [#allocation2]  }
 0x1a8   :  { %s442_s17 = sshll.u32 %s493_s3, 4  ;;  %s443_s17 = int_to_ptr.vmem [resolvable:$true] %s442_s17 }
 0x1a9   :  { %s469_s18 = scalar_lea.vmem %s443_s17, 128  ;;  %s473_s19 = scalar_lea.vmem %s443_s17, 256 }
 0x1aa   :  { %p470_p0 = scmp.ne.s32.totalorder %s443_s17, %s469_s18  ;;  %p474_p1 = scmp.lt.s32.totalorder %s443_s17, %s443_s17 }
 0x1ab   :  { %p475_p2 = scmp.lt.s32.totalorder %s473_s19, %s469_s18 }
 0x1ad   :  { %p476_p3 = por %p475_p2, %p474_p1 }
 0x1af   :  { %p477_p4 = pnand %p476_p3, %p470_p0 }
 0x1b1   :  { %480 = shalt.err (!%p477_p4)
}
 0x1b2   :  { %445 = dma.vmem_to_hbm [thread:$0]  %s443_s17, 128, %s582_s5, [#allocation3]  }
 0x1b3   :  { %489 = dma.done.wait [#allocation3], 256  }
 0x1b4   :  { %490 = vsyncadd [#allocation3], 4294967040 }
 0x1b5   :  { %449 = vsyncpa [#allocation3], 1 }

</bundles_post_ra>
